<compile_context>
chip_gen: v7x
topology: tpu7x:2x2x1
jax: 0.10.0
libtpu: 0.0.40
codegen_flags: <defaults>
</compile_context>

<pallas_src>
import functools

import jax
import jax.numpy as jnp
from jax.experimental import pallas as pl
from jax.experimental.pallas import tpu as pltpu

_LANE = 128
_TB_MAX = 2048                      # per-step batch-tile cap (~8 MiB footprint)
_VMEM_LIMIT = 32 * 1024 * 1024      # explicit scoped-VMEM limit (v5e default is 16 MiB)


def _round_up(x, m):
    return (x + m - 1) // m * m


def _cdiv(a, b):
    return -(-a // b)


def _choose_batch_tile(batch, tb_max):
    """Balanced tiling: fewest steps under tb_max, but >= 2 steps when the
    batch is big enough so the 'parallel' axis can shard across both
    TensorCores on v7x.  Tile rounded to the 8-sublane granule."""
    n_steps = max(_cdiv(batch, tb_max), 1)
    if batch >= 16 and n_steps < 2:
        n_steps = 2
    return _round_up(_cdiv(batch, n_steps), 8)


def _gelu_tanh(x):
    # tanh-approx GELU: transcendental runs on the EUP (separate bundle slot).
    # ~1e-3 deviation from PyTorch's exact erf GELU.
    return jax.nn.gelu(x, approximate=True)


def _gelu_erf(x):
    # Exact (erf) GELU, matching PyTorch nn.GELU() default — reference only.
    return 0.5 * x * (1.0 + jax.lax.erf(x / jnp.sqrt(2.0).astype(x.dtype)))


def dqn_kernel(x_ref,
               w1_ref, b1_ref,
               w2_ref, b2_ref,
               w3_ref, b3_ref,
               w4_ref, b4_ref,
               o_ref, *, out_dim):
    x = x_ref[...]                                    # (TB, in_dim) f32

    h1 = jnp.dot(x.astype(jnp.bfloat16), w1_ref[...],
                 preferred_element_type=jnp.float32) + b1_ref[...]
    h1 = _gelu_tanh(h1)

    h2 = jnp.dot(h1.astype(jnp.bfloat16), w2_ref[...],
                 preferred_element_type=jnp.float32) + b2_ref[...]
    h2 = _gelu_tanh(h2)

    h3 = jnp.dot(h2.astype(jnp.bfloat16), w3_ref[...],
                 preferred_element_type=jnp.float32) + b3_ref[...]
    h3 = jnp.maximum(h3, 0.0)                         # (TB, 128) lane-dense

    out = jnp.dot(h3.astype(jnp.bfloat16), w4_ref[...],
                  preferred_element_type=jnp.float32) + b4_ref[...]

    # Keep the padded (TB, 128) MXU compute, but write only the useful
    # columns back to HBM (narrow store; DMA saving dominates on a mem-bound
    # kernel).
    o_ref[...] = out[:, :out_dim].astype(o_ref.dtype)


@functools.partial(jax.jit, static_argnames=("output_dim", "tb_max"))
def dqn_forward(x, kparams, output_dim, tb_max=_TB_MAX):
    """x: (B, input_dim) f32. kparams: dict from prepare_params()."""
    B, in_dim = x.shape
    out_pad = kparams["w4"].shape[1]
    hid1 = kparams["w1"].shape[1]
    hid2 = kparams["w2"].shape[1]
    hid3 = kparams["w3"].shape[1]

    # Balanced batch tiles; pad B so every grid step is a full block.
    tb = _choose_batch_tile(B, tb_max)
    Bp = _round_up(B, tb)
    if Bp != B:
        x = jnp.pad(x, ((0, Bp - B), (0, 0)))
    grid = (Bp // tb,)

    def _const(i):
        return (0, 0)   # weights/biases: same block every step -> VMEM-resident

    param_order = ("w1", "b1", "w2", "b2", "w3", "b3", "w4", "b4")
    param_specs = [pl.BlockSpec(kparams[name].shape, _const)
                   for name in param_order]

    # Advisory cost estimate for XLA scheduling around the custom call.
    flops = 2 * Bp * (in_dim * hid1 + hid1 * hid2 + hid2 * hid3
                      + hid3 * out_pad)
    transcendentals = Bp * (hid1 + hid2)              # one tanh per GELU element
    bytes_accessed = (Bp * in_dim * 4 + Bp * output_dim * 4
                      + sum(int(kparams[k].size) * kparams[k].dtype.itemsize
                            for k in param_order))

    kern = functools.partial(dqn_kernel, out_dim=output_dim)

    out = pl.pallas_call(
        kern,
        out_shape=jax.ShapeDtypeStruct((Bp, output_dim), jnp.float32),
        grid=grid,
        in_specs=[pl.BlockSpec((tb, in_dim), lambda i: (i, 0))] + param_specs,
        out_specs=pl.BlockSpec((tb, output_dim), lambda i: (i, 0)),
        compiler_params=pltpu.CompilerParams(
            dimension_semantics=("parallel",),        # megacore sharding on v7x
            vmem_limit_bytes=_VMEM_LIMIT),
        cost_estimate=pl.CostEstimate(
            flops=flops,
            transcendentals=transcendentals,
            bytes_accessed=bytes_accessed),
    )(x,
      kparams["w1"], kparams["b1"],
      kparams["w2"], kparams["b2"],
      kparams["w3"], kparams["b3"],
      kparams["w4"], kparams["b4"])

    return out[:B]


def init_params(key, input_dim, output_dim):
    """nn.Linear-style init (uniform +/- 1/sqrt(fan_in)), f32, weights stored
    transposed relative to PyTorch: (fan_in, fan_out); biases (1, fan_out)."""
    dims = [(input_dim, 256), (256, 128), (128, 64), (64, output_dim)]
    params = {}
    for i, (fan_in, fan_out) in enumerate(dims, start=1):
        key, kw, kb = jax.random.split(key, 3)
        bound = 1.0 / jnp.sqrt(fan_in)
        params[f"w{i}"] = jax.random.uniform(
            kw, (fan_in, fan_out), jnp.float32, -bound, bound)
        params[f"b{i}"] = jax.random.uniform(
            kb, (1, fan_out), jnp.float32, -bound, bound)
    return params


def prepare_params(params, output_dim):
    """Kernel-side params: bf16 weights (MXU-native, halves weight DMA), f32
    biases.  Layer 3 zero-padded to a lane-dense 128 width and layer 4 padded
    to a 128-wide MXU output (ReLU(0)=0 and zero w4 rows contribute nothing,
    so numerics are unchanged; the kernel stores only the first output_dim
    columns)."""
    h3 = params["w3"].shape[1]                   # 64
    h3_pad = _round_up(h3, _LANE)                # 128
    out_pad = _round_up(output_dim, _LANE)       # 128 for small heads

    w3 = jnp.pad(params["w3"], ((0, 0), (0, h3_pad - h3)))
    b3 = jnp.pad(params["b3"], ((0, 0), (0, h3_pad - h3)))
    w4 = jnp.pad(params["w4"], ((0, h3_pad - params["w4"].shape[0]),
                                (0, out_pad - output_dim)))
    b4 = jnp.pad(params["b4"], ((0, 0), (0, out_pad - output_dim)))

    return {
        "w1": params["w1"].astype(jnp.bfloat16),
        "b1": params["b1"].astype(jnp.float32),
        "w2": params["w2"].astype(jnp.bfloat16),
        "b2": params["b2"].astype(jnp.float32),
        "w3": w3.astype(jnp.bfloat16),
        "b3": b3.astype(jnp.float32),
        "w4": w4.astype(jnp.bfloat16),
        "b4": b4.astype(jnp.float32),
    }


def dqn_reference_exact(x, params):
    """Exact-erf, full-f32 reference (matches PyTorch semantics)."""
    h = _gelu_erf(x @ params["w1"] + params["b1"])
    h = _gelu_erf(h @ params["w2"] + params["b2"])
    h = jnp.maximum(h @ params["w3"] + params["b3"], 0.0)
    return h @ params["w4"] + params["b4"]


def dqn_reference_matched(x, kparams, output_dim):
    """Reference with the same bf16 matmuls + tanh GELU as the kernel."""
    def lin(h, w, b):
        return jnp.dot(h.astype(jnp.bfloat16), w,
                       preferred_element_type=jnp.float32) + b
    h = _gelu_tanh(lin(x, kparams["w1"], kparams["b1"]))
    h = _gelu_tanh(lin(h, kparams["w2"], kparams["b2"]))
    h = jnp.maximum(lin(h, kparams["w3"], kparams["b3"]), 0.0)
    return lin(h, kparams["w4"], kparams["b4"])[:, :output_dim]


if __name__ == "__main__":
    input_dim = 16
    output_dim = 4

    key = jax.random.PRNGKey(0)
    key, kx1, kx2 = jax.random.split(key, 3)
    params = init_params(key, input_dim, output_dim)
    kparams = prepare_params(params, output_dim)

    # Small batch: single grid step.
    batch = 8
    x = jax.random.normal(kx1, (batch, input_dim), jnp.float32)
    out = jax.block_until_ready(dqn_forward(x, kparams, output_dim))
    assert out.shape == (batch, output_dim)

    ref_matched = dqn_reference_matched(x, kparams, output_dim)
    ref_exact = dqn_reference_exact(x, params)[:, :output_dim]
    assert jnp.allclose(out, ref_matched, atol=1e-2, rtol=1e-2), \
        "mismatch vs matched (bf16 + tanh-GELU) reference"
    # Documented tolerance vs PyTorch-exact semantics: bf16 weights + tanh GELU.
    assert jnp.allclose(out, ref_exact, atol=5e-2, rtol=5e-2), \
        "mismatch vs exact f32 erf reference"

    # Larger, non-multiple batch: exercises balanced tiling + 2-step grid
    # (batch padding + narrow output store across multiple grid steps).
    batch2 = 300
    x2 = jax.random.normal(kx2, (batch2, input_dim), jnp.float32)
    out2 = jax.block_until_ready(dqn_forward(x2, kparams, output_dim))
    assert out2.shape == (batch2, output_dim)
    ref2 = dqn_reference_matched(x2, kparams, output_dim)
    assert jnp.allclose(out2, ref2, atol=1e-2, rtol=1e-2), \
        "multi-step grid mismatch vs matched reference"

    print("KERNEL_OK")
</pallas_src>

<mosaic_0001>
module attributes {stable_mosaic.version = 11 : i64} {
  func.func @dqn_kernel(%arg0: i32, %arg1: memref<8x16xf32, #tpu.memory_space<vmem>>, %arg2: memref<16x256xbf16, #tpu.memory_space<vmem>>, %arg3: memref<1x256xf32, #tpu.memory_space<vmem>>, %arg4: memref<256x128xbf16, #tpu.memory_space<vmem>>, %arg5: memref<1x128xf32, #tpu.memory_space<vmem>>, %arg6: memref<128x128xbf16, #tpu.memory_space<vmem>>, %arg7: memref<1x128xf32, #tpu.memory_space<vmem>>, %arg8: memref<128x128xbf16, #tpu.memory_space<vmem>>, %arg9: memref<1x128xf32, #tpu.memory_space<vmem>>, %arg10: memref<8x4xf32, #tpu.memory_space<vmem>>) attributes {dimension_semantics = [#tpu.dimension_semantics<parallel>], iteration_bounds = array<i64: 1>, scalar_prefetch = 0 : i64, scratch_operands = 0 : i64, tpu.core_type = #tpu.core_type<tc>, window_params = [{transform_indices = @transform_0, window_bounds = array<i64: 8, 16>}, {pipeline_mode = #tpu.pipeline_mode<synchronous>, transform_indices = @transform_1, window_bounds = array<i64: 16, 256>}, {pipeline_mode = #tpu.pipeline_mode<synchronous>, transform_indices = @transform_2, window_bounds = array<i64: 1, 256>}, {pipeline_mode = #tpu.pipeline_mode<synchronous>, transform_indices = @transform_3, window_bounds = array<i64: 256, 128>}, {pipeline_mode = #tpu.pipeline_mode<synchronous>, transform_indices = @transform_4, window_bounds = array<i64: 1, 128>}, {pipeline_mode = #tpu.pipeline_mode<synchronous>, transform_indices = @transform_5, window_bounds = array<i64: 128, 128>}, {pipeline_mode = #tpu.pipeline_mode<synchronous>, transform_indices = @transform_6, window_bounds = array<i64: 1, 128>}, {pipeline_mode = #tpu.pipeline_mode<synchronous>, transform_indices = @transform_7, window_bounds = array<i64: 128, 128>}, {pipeline_mode = #tpu.pipeline_mode<synchronous>, transform_indices = @transform_8, window_bounds = array<i64: 1, 128>}, {transform_indices = @transform_9, window_bounds = array<i64: 8, 4>}]} {
    %c0 = arith.constant 0 : index
    %c0_0 = arith.constant 0 : index
    %0 = vector.load %arg1[%c0, %c0_0] : memref<8x16xf32, #tpu.memory_space<vmem>>, vector<8x16xf32>
    %1 = arith.truncf %0 : vector<8x16xf32> to vector<8x16xbf16>
    %c0_1 = arith.constant 0 : index
    %c0_2 = arith.constant 0 : index
    %2 = vector.load %arg2[%c0_1, %c0_2] : memref<16x256xbf16, #tpu.memory_space<vmem>>, vector<16x256xbf16>
    %cst = arith.constant dense<0.000000e+00> : vector<8x256xf32>
    %3 = tpu.matmul %1, %2, %cst {dimension_numbers = #tpu.dot_dimension_numbers<[1], [0], [0], [1], [0, 0, 1, 1], [], []>} : vector<8x16xbf16>, vector<16x256xbf16>, vector<8x256xf32> -> vector<8x256xf32>
    %c0_3 = arith.constant 0 : index
    %c0_4 = arith.constant 0 : index
    %4 = vector.load %arg3[%c0_3, %c0_4] : memref<1x256xf32, #tpu.memory_space<vmem>>, vector<1x256xf32>
    %5 = vector.broadcast %4 : vector<1x256xf32> to vector<8x256xf32>
    %6 = arith.addf %3, %5 : vector<8x256xf32>
    %7 = arith.mulf %6, %6 : vector<8x256xf32>
    %8 = arith.mulf %6, %7 : vector<8x256xf32>
    %cst_5 = arith.constant 4.471500e-02 : f32
    %9 = vector.broadcast %cst_5 : f32 to vector<8x256xf32>
    %10 = arith.mulf %9, %8 : vector<8x256xf32>
    %11 = arith.addf %6, %10 : vector<8x256xf32>
    %cst_6 = arith.constant 0.797884583 : f32
    %12 = vector.broadcast %cst_6 : f32 to vector<8x256xf32>
    %13 = arith.mulf %12, %11 : vector<8x256xf32>
    %14 = math.tanh %13 : vector<8x256xf32>
    %cst_7 = arith.constant 1.000000e+00 : f32
    %15 = vector.broadcast %cst_7 : f32 to vector<8x256xf32>
    %16 = arith.addf %15, %14 : vector<8x256xf32>
    %cst_8 = arith.constant 5.000000e-01 : f32
    %17 = vector.broadcast %cst_8 : f32 to vector<8x256xf32>
    %18 = arith.mulf %17, %16 : vector<8x256xf32>
    %19 = arith.mulf %6, %18 : vector<8x256xf32>
    %20 = arith.truncf %19 : vector<8x256xf32> to vector<8x256xbf16>
    %c0_9 = arith.constant 0 : index
    %c0_10 = arith.constant 0 : index
    %21 = vector.load %arg4[%c0_9, %c0_10] : memref<256x128xbf16, #tpu.memory_space<vmem>>, vector<256x128xbf16>
    %cst_11 = arith.constant dense<0.000000e+00> : vector<8x128xf32>
    %22 = tpu.matmul %20, %21, %cst_11 {dimension_numbers = #tpu.dot_dimension_numbers<[1], [0], [0], [1], [0, 0, 1, 1], [], []>} : vector<8x256xbf16>, vector<256x128xbf16>, vector<8x128xf32> -> vector<8x128xf32>
    %c0_12 = arith.constant 0 : index
    %c0_13 = arith.constant 0 : index
    %23 = vector.load %arg5[%c0_12, %c0_13] : memref<1x128xf32, #tpu.memory_space<vmem>>, vector<1x128xf32>
    %24 = vector.broadcast %23 : vector<1x128xf32> to vector<8x128xf32>
    %25 = arith.addf %22, %24 : vector<8x128xf32>
    %26 = arith.mulf %25, %25 : vector<8x128xf32>
    %27 = arith.mulf %25, %26 : vector<8x128xf32>
    %cst_14 = arith.constant 4.471500e-02 : f32
    %28 = vector.broadcast %cst_14 : f32 to vector<8x128xf32>
    %29 = arith.mulf %28, %27 : vector<8x128xf32>
    %30 = arith.addf %25, %29 : vector<8x128xf32>
    %cst_15 = arith.constant 0.797884583 : f32
    %31 = vector.broadcast %cst_15 : f32 to vector<8x128xf32>
    %32 = arith.mulf %31, %30 : vector<8x128xf32>
    %33 = math.tanh %32 : vector<8x128xf32>
    %cst_16 = arith.constant 1.000000e+00 : f32
    %34 = vector.broadcast %cst_16 : f32 to vector<8x128xf32>
    %35 = arith.addf %34, %33 : vector<8x128xf32>
    %cst_17 = arith.constant 5.000000e-01 : f32
    %36 = vector.broadcast %cst_17 : f32 to vector<8x128xf32>
    %37 = arith.mulf %36, %35 : vector<8x128xf32>
    %38 = arith.mulf %25, %37 : vector<8x128xf32>
    %39 = arith.truncf %38 : vector<8x128xf32> to vector<8x128xbf16>
    %c0_18 = arith.constant 0 : index
    %c0_19 = arith.constant 0 : index
    %40 = vector.load %arg6[%c0_18, %c0_19] : memref<128x128xbf16, #tpu.memory_space<vmem>>, vector<128x128xbf16>
    %cst_20 = arith.constant dense<0.000000e+00> : vector<8x128xf32>
    %41 = tpu.matmul %39, %40, %cst_20 {dimension_numbers = #tpu.dot_dimension_numbers<[1], [0], [0], [1], [0, 0, 1, 1], [], []>} : vector<8x128xbf16>, vector<128x128xbf16>, vector<8x128xf32> -> vector<8x128xf32>
    %c0_21 = arith.constant 0 : index
    %c0_22 = arith.constant 0 : index
    %42 = vector.load %arg7[%c0_21, %c0_22] : memref<1x128xf32, #tpu.memory_space<vmem>>, vector<1x128xf32>
    %43 = vector.broadcast %42 : vector<1x128xf32> to vector<8x128xf32>
    %44 = arith.addf %41, %43 : vector<8x128xf32>
    %cst_23 = arith.constant 0.000000e+00 : f32
    %45 = vector.broadcast %cst_23 : f32 to vector<8x128xf32>
    %46 = arith.maximumf %44, %45 : vector<8x128xf32>
    %47 = arith.truncf %46 : vector<8x128xf32> to vector<8x128xbf16>
    %c0_24 = arith.constant 0 : index
    %c0_25 = arith.constant 0 : index
    %48 = vector.load %arg8[%c0_24, %c0_25] : memref<128x128xbf16, #tpu.memory_space<vmem>>, vector<128x128xbf16>
    %cst_26 = arith.constant dense<0.000000e+00> : vector<8x128xf32>
    %49 = tpu.matmul %47, %48, %cst_26 {dimension_numbers = #tpu.dot_dimension_numbers<[1], [0], [0], [1], [0, 0, 1, 1], [], []>} : vector<8x128xbf16>, vector<128x128xbf16>, vector<8x128xf32> -> vector<8x128xf32>
    %c0_27 = arith.constant 0 : index
    %c0_28 = arith.constant 0 : index
    %50 = vector.load %arg9[%c0_27, %c0_28] : memref<1x128xf32, #tpu.memory_space<vmem>>, vector<1x128xf32>
    %51 = vector.broadcast %50 : vector<1x128xf32> to vector<8x128xf32>
    %52 = arith.addf %49, %51 : vector<8x128xf32>
    %53 = vector.extract_strided_slice %52 {offsets = [0, 0], sizes = [8, 4], strides = [1, 1]} : vector<8x128xf32> to vector<8x4xf32>
    %c0_29 = arith.constant 0 : index
    %c0_30 = arith.constant 0 : index
    %54 = vector.load %arg10[%c0_29, %c0_30] : memref<8x4xf32, #tpu.memory_space<vmem>>, vector<8x4xf32>
    tpu.vector_store %arg10[%c0_29, %c0_30], %53 {strides = array<i32>} : memref<8x4xf32, #tpu.memory_space<vmem>>, vector<8x4xf32>,
    return
  }
  func.func @transform_0(%arg0: i32) -> (i32, i32) {
    %c0_i32 = arith.constant 0 : i32
    %c0_i32_0 = arith.constant 0 : i32
    return %arg0, %c0_i32 : i32, i32
  }
  func.func @transform_1(%arg0: i32) -> (i32, i32) {
    %c0_i32 = arith.constant 0 : i32
    %c0_i32_0 = arith.constant 0 : i32
    %c0_i32_1 = arith.constant 0 : i32
    return %c0_i32, %c0_i32_0 : i32, i32
  }
  func.func @transform_2(%arg0: i32) -> (i32, i32) {
    %c0_i32 = arith.constant 0 : i32
    %c0_i32_0 = arith.constant 0 : i32
    %c0_i32_1 = arith.constant 0 : i32
    return %c0_i32, %c0_i32_0 : i32, i32
  }
  func.func @transform_3(%arg0: i32) -> (i32, i32) {
    %c0_i32 = arith.constant 0 : i32
    %c0_i32_0 = arith.constant 0 : i32
    %c0_i32_1 = arith.constant 0 : i32
    return %c0_i32, %c0_i32_0 : i32, i32
  }
  func.func @transform_4(%arg0: i32) -> (i32, i32) {
    %c0_i32 = arith.constant 0 : i32
    %c0_i32_0 = arith.constant 0 : i32
    %c0_i32_1 = arith.constant 0 : i32
    return %c0_i32, %c0_i32_0 : i32, i32
  }
  func.func @transform_5(%arg0: i32) -> (i32, i32) {
    %c0_i32 = arith.constant 0 : i32
    %c0_i32_0 = arith.constant 0 : i32
    %c0_i32_1 = arith.constant 0 : i32
    return %c0_i32, %c0_i32_0 : i32, i32
  }
  func.func @transform_6(%arg0: i32) -> (i32, i32) {
    %c0_i32 = arith.constant 0 : i32
    %c0_i32_0 = arith.constant 0 : i32
    %c0_i32_1 = arith.constant 0 : i32
    return %c0_i32, %c0_i32_0 : i32, i32
  }
  func.func @transform_7(%arg0: i32) -> (i32, i32) {
    %c0_i32 = arith.constant 0 : i32
    %c0_i32_0 = arith.constant 0 : i32
    %c0_i32_1 = arith.constant 0 : i32
    return %c0_i32, %c0_i32_0 : i32, i32
  }
  func.func @transform_8(%arg0: i32) -> (i32, i32) {
    %c0_i32 = arith.constant 0 : i32
    %c0_i32_0 = arith.constant 0 : i32
    %c0_i32_1 = arith.constant 0 : i32
    return %c0_i32, %c0_i32_0 : i32, i32
  }
  func.func @transform_9(%arg0: i32) -> (i32, i32) {
    %c0_i32 = arith.constant 0 : i32
    %c0_i32_0 = arith.constant 0 : i32
    return %arg0, %c0_i32 : i32, i32
  }
}

</mosaic_0001>

<bundles_post_ra>
// kernel: dqn_forward.1
= control target key start
LH: loop header
LB: loop body
LE: loop exit
PB: predicated region body
PF: predicated region fallthrough
CT: control target
= control target key end

     0   :  { %14 = vsyncpa [#allocation3], 0  ;;  %s1148_s0 = inlined_call_operand.hbm [shape: f32[8,16], index: 0, kind: input, shape index: {}]   ;;  %s1149_s1 = inlined_call_operand.vmem [shape: bf16[16,256], index: 1, kind: input, shape index: {}]   ;;  %s1150_s2 = inlined_call_operand.vmem [shape: f32[1,256], index: 2, kind: input, shape index: {}]   ;;  %s1151_s3 = inlined_call_operand.hbm [shape: bf16[256,128], index: 3, kind: input, shape index: {}]   ;;  %s1152_s4 = inlined_call_operand.hbm [shape: f32[1,128], index: 4, kind: input, shape index: {}]   ;;  %s1153_s5 = inlined_call_operand.hbm [shape: bf16[128,128], index: 5, kind: input, shape index: {}]   ;;  %s1154_s6 = inlined_call_operand.hbm [shape: f32[1,128], index: 6, kind: input, shape index: {}]   ;;  %s1155_s7 = inlined_call_operand.hbm [shape: bf16[128,128], index: 7, kind: input, shape index: {}]   ;;  %s1156_s8 = inlined_call_operand.hbm [shape: f32[1,128], index: 8, kind: input, shape index: {}]   ;;  %s1157_s9 = inlined_call_operand.vmem [shape: f32[8,4], index: 9, kind: output, shape index: {}]  }
   0x1   :  { %15 = vsyncpa [#allocation5], 0 }
   0x2   :  { %16 = vsyncpa [#allocation8], 0 }
   0x3   :  { %17 = vsyncpa [#allocation11], 0  ;;  %s963_s30 = smov [#allocation4]   ;;  %s801_s13 = scalar_lea.hbm %s1151_s3, 2048 }
   0x4   :  { %s37_s10 = sshll.u32 %s963_s30, 4  ;;  %p802_p0 = scmp.ne.s32.totalorder %s1151_s3, %s801_s13  ;;  %s38_s10 = int_to_ptr.vmem [resolvable:$true] %s37_s10 }
   0x5   :  { %p805_p1 = scmp.lt.u32.totalorder %s801_s13, %s1151_s3 }
   0x7   :  { %p807_p2 = pnand %p805_p1, %p802_p0 }
   0x9   :  { %810 = shalt.err (!%p807_p2)
}
   0xa   :  { %s811_s18 = scalar_lea.vmem %s38_s10, 2048  ;;  %p816_p4 = scmp.lt.s32.totalorder %s38_s10, %s38_s10 }
   0xb   :  { %p812_p3 = scmp.ne.s32.totalorder %s38_s10, %s811_s18  ;;  %p817_p5 = scmp.lt.s32.totalorder %s811_s18, %s811_s18 }
   0xd   :  { %p818_p6 = por %p817_p5, %p816_p4 }
   0xf   :  { %p819_p7 = pnand %p818_p6, %p812_p3 }
  0x11   :  { %822 = shalt.err (!%p819_p7)
}
  0x12   :  { %s964_s19 = smov 64   ;;  %s965_s20 = smov 4  }
  0x13   :  { %43 = dma.hbm_to_vmem [thread:$0]  %s1151_s3, 2048, %s38_s10, [#allocation5], %s964_s19, %s964_s19, %s965_s20  }
  0x14   :  { %s966_s23 = smov [#allocation7]   ;;  %s967_s25 = smov [#allocation10]  }
  0x15   :  { %s59_s24 = sshll.u32 %s966_s23, 4  ;;  %s81_s26 = sshll.u32 %s967_s25, 4  ;;  %s60_s24 = int_to_ptr.vmem [resolvable:$true] %s59_s24  ;;  %s82_s26 = int_to_ptr.vmem [resolvable:$true] %s81_s26 }
  0x16   :  { %s823_s29 = scalar_lea.hbm %s1153_s5, 1024 }
  0x17   :  { %p824_p8 = scmp.ne.s32.totalorder %s1153_s5, %s823_s29  ;;  %p827_p9 = scmp.lt.u32.totalorder %s823_s29, %s1153_s5 }
  0x19   :  { %p829_p10 = pnand %p827_p9, %p824_p8 }
  0x1b   :  { %832 = shalt.err (!%p829_p10)
}
  0x1c   :  { %s833_s3 = scalar_lea.vmem %s60_s24, 1024  ;;  %p838_p12 = scmp.lt.s32.totalorder %s60_s24, %s60_s24 }
  0x1d   :  { %p834_p11 = scmp.ne.s32.totalorder %s60_s24, %s833_s3  ;;  %p839_p13 = scmp.lt.s32.totalorder %s833_s3, %s833_s3 }
  0x1f   :  { %p840_p0 = por %p839_p13, %p838_p12 }
  0x21   :  { %p841_p1 = pnand %p840_p0, %p834_p11 }
  0x23   :  { %844 = shalt.err (!%p841_p1)
}
  0x24   :  { %65 = dma.hbm_to_vmem [thread:$0]  %s1153_s5, 1024, %s60_s24, [#allocation8], %s964_s19, %s964_s19, %s965_s20  }
  0x25   :  { %s845_s17 = scalar_lea.hbm %s1155_s7, 1024 }
  0x26   :  { %p846_p2 = scmp.ne.s32.totalorder %s1155_s7, %s845_s17  ;;  %p849_p3 = scmp.lt.u32.totalorder %s845_s17, %s1155_s7 }
  0x28   :  { %p851_p4 = pnand %p849_p3, %p846_p2 }
  0x2a   :  { %854 = shalt.err (!%p851_p4)
}
  0x2b   :  { %s855_s25 = scalar_lea.vmem %s82_s26, 1024  ;;  %p860_p6 = scmp.lt.s32.totalorder %s82_s26, %s82_s26 }
  0x2c   :  { %p856_p5 = scmp.ne.s32.totalorder %s82_s26, %s855_s25  ;;  %p861_p7 = scmp.lt.s32.totalorder %s855_s25, %s855_s25 }
  0x2e   :  { %p862_p8 = por %p861_p7, %p860_p6 }
  0x30   :  { %p863_p9 = pnand %p862_p8, %p856_p5 }
  0x32   :  { %866 = shalt.err (!%p863_p9)
}
  0x33   :  { %87 = dma.hbm_to_vmem [thread:$0]  %s1155_s7, 1024, %s82_s26, [#allocation11], %s964_s19, %s964_s19, %s965_s20  }
  0x34   :  { %s968_s27 = smov [#allocation2]   ;;  %s969_s29 = smov [#allocation6]  }
  0x35   :  { %s24_s28 = sshll.u32 %s968_s27, 4  ;;  %s50_s30 = sshll.u32 %s969_s29, 4  ;;  %s25_s28 = int_to_ptr.vmem [resolvable:$true] %s24_s28  ;;  %s51_s30 = int_to_ptr.vmem [resolvable:$true] %s50_s30 }
  0x36   :  { %s867_s13 = scalar_lea.hbm %s1148_s0, 128 }
  0x37   :  { %p868_p10 = scmp.ne.s32.totalorder %s1148_s0, %s867_s13  ;;  %p871_p11 = scmp.lt.u32.totalorder %s867_s13, %s1148_s0 }
  0x39   :  { %p873_p12 = pnand %p871_p11, %p868_p10 }
  0x3b   :  { %876 = shalt.err (!%p873_p12)
}
  0x3c   :  { %s877_s7 = scalar_lea.vmem %s25_s28, 128  ;;  %p882_p0 = scmp.lt.s32.totalorder %s25_s28, %s25_s28 }
  0x3d   :  { %p878_p13 = scmp.ne.s32.totalorder %s25_s28, %s877_s7  ;;  %p883_p1 = scmp.lt.s32.totalorder %s877_s7, %s877_s7 }
  0x3f   :  { %p884_p2 = por %p883_p1, %p882_p0 }
  0x41   :  { %p885_p3 = pnand %p884_p2, %p878_p13 }
  0x43   :  { %888 = shalt.err (!%p885_p3)
}
  0x44   :  { %27 = dma.hbm_to_vmem [thread:$0]  %s1148_s0, 128, %s25_s28, [#allocation3]  }
  0x45   :  { %s889_s17 = scalar_lea.hbm %s1152_s4, 16 }
  0x46   :  { %p890_p4 = scmp.ne.s32.totalorder %s1152_s4, %s889_s17  ;;  %p893_p5 = scmp.lt.u32.totalorder %s889_s17, %s1152_s4 }
  0x48   :  { %p895_p6 = pnand %p893_p5, %p890_p4 }
  0x4a   :  { %898 = shalt.err (!%p895_p6)
}
  0x4b   :  { %s899_s25 = scalar_lea.vmem %s51_s30, 16  ;;  %s903_s5 = scalar_lea.vmem %s51_s30, 32 }
  0x4c   :  { %p900_p7 = scmp.ne.s32.totalorder %s51_s30, %s899_s25  ;;  %p904_p8 = scmp.lt.s32.totalorder %s51_s30, %s51_s30 }
  0x4d   :  { %p905_p9 = scmp.lt.s32.totalorder %s903_s5, %s899_s25 }
  0x4f   :  { %p906_p10 = por %p905_p9, %p904_p8 }
  0x51   :  { %p907_p11 = pnand %p906_p10, %p900_p7 }
  0x53   :  { %910 = shalt.err (!%p907_p11)
}
  0x54   :  { %53 = dma.hbm_to_vmem [thread:$0]  %s1152_s4, 16, %s51_s30, [#allocation5]  }
  0x55   :  { %s970_s27 = smov [#allocation9]   ;;  %s971_s29 = smov [#allocation12]  }
  0x56   :  { %s72_s28 = sshll.u32 %s970_s27, 4  ;;  %s94_s11 = sshll.u32 %s971_s29, 4  ;;  %s73_s28 = int_to_ptr.vmem [resolvable:$true] %s72_s28  ;;  %s95_s11 = int_to_ptr.vmem [resolvable:$true] %s94_s11 }
  0x57   :  { %s911_s3 = scalar_lea.hbm %s1154_s6, 16 }
  0x58   :  { %p912_p12 = scmp.ne.s32.totalorder %s1154_s6, %s911_s3  ;;  %p915_p13 = scmp.lt.u32.totalorder %s911_s3, %s1154_s6 }
  0x5a   :  { %p917_p0 = pnand %p915_p13, %p912_p12 }
  0x5c   :  { %920 = shalt.err (!%p917_p0)
}
  0x5d   :  { %s921_s4 = scalar_lea.vmem %s73_s28, 16  ;;  %s925_s30 = scalar_lea.vmem %s73_s28, 32 }
  0x5e   :  { %p922_p1 = scmp.ne.s32.totalorder %s73_s28, %s921_s4  ;;  %p926_p2 = scmp.lt.s32.totalorder %s73_s28, %s73_s28 }
  0x5f   :  { %p927_p3 = scmp.lt.s32.totalorder %s925_s30, %s921_s4 }
  0x61   :  { %p928_p4 = por %p927_p3, %p926_p2 }
  0x63   :  { %p929_p5 = pnand %p928_p4, %p922_p1 }
  0x65   :  { %932 = shalt.err (!%p929_p5)
}
  0x66   :  { %75 = dma.hbm_to_vmem [thread:$0]  %s1154_s6, 16, %s73_s28, [#allocation8]  }
  0x67   :  { %s933_s17 = scalar_lea.hbm %s1156_s8, 16 }
  0x68   :  { %p934_p6 = scmp.ne.s32.totalorder %s1156_s8, %s933_s17  ;;  %p937_p7 = scmp.lt.u32.totalorder %s933_s17, %s1156_s8 }
  0x6a   :  { %p939_p8 = pnand %p937_p7, %p934_p6 }
  0x6c   :  { %942 = shalt.err (!%p939_p8)
}
  0x6d   :  { %s943_s25 = scalar_lea.vmem %s95_s11, 16  ;;  %s947_s5 = scalar_lea.vmem %s95_s11, 32 }
  0x6e   :  { %p944_p9 = scmp.ne.s32.totalorder %s95_s11, %s943_s25  ;;  %p948_p10 = scmp.lt.s32.totalorder %s95_s11, %s95_s11 }
  0x6f   :  { %p949_p11 = scmp.lt.s32.totalorder %s947_s5, %s943_s25 }
  0x71   :  { %p950_p12 = por %p949_p11, %p948_p10 }
  0x73   :  { %p951_p13 = pnand %p950_p12, %p944_p9 }
  0x75   :  { %954 = shalt.err (!%p951_p13)
}
  0x76   :  { %97 = dma.hbm_to_vmem [thread:$0]  %s1156_s8, 16, %s95_s11, [#allocation11]  }
  0x77   :  { %955 = dma.done.wait [#allocation3], 128  }
  0x78   :  { %956 = vsyncadd [#allocation3], 4294967168 }
  0x79   :  { %957 = dma.done.wait [#allocation5], 2064  }
  0x7a   :  { %958 = vsyncadd [#allocation5], 4294965232 }
  0x7b   :  { %959 = dma.done.wait [#allocation8], 1040  }
  0x7c   :  { %960 = vsyncadd [#allocation8], 4294966256 }
  0x7d   :  { %961 = dma.done.wait [#allocation11], 1040  }
  0x7e   :  { %962 = vsyncadd [#allocation11], 4294966256  ;;  %v972_v0 = vmov 0   ;;  %v760_v1 = vld [vmem:[%s1149_s1 + $0x4] ss:$8 sps:$4 sm:$0xff]   ;;  %v120_v3 = vld [vmem:[#allocation2] sm:$0xff]  ;;  %v126_v21 = vlaneseq }
  0x7f   :  { %182 = vmatprep.mubr.bf16.mxu0 %v972_v0  ;;  %v762_v2 = vld [vmem:[%s1149_s1] ss:$8 sps:$4 sm:$0xff]   ;;  %vm146_vm0 = vcmask 130048   ;;  %150 = vmatprep.subr.bf16.mxu0 %v760_v1  ;;  %v121_v4 = vpack.c.bf16 %v120_v3, %v120_v3  ;;  %v767_v9 = vld [vmem:[#allocation4 + $0x50] sm:$0xff]   ;;  %v769_v11 = vld [vmem:[#allocation4 + $0x58] sm:$0xff]   ;;  %v973_v55 = vmov 0.0  }
  0x80   :  { %151 = vmatpush1.bf16.msra.mxu0 %v762_v2  ;;  %v763_v5 = vld [vmem:[#allocation4 + $0x40] sm:$0xff]   ;;  %v765_v7 = vld [vmem:[#allocation4 + $0x48] sm:$0xff]   ;;  %v768_v10 = vld [vmem:[#allocation4 + $0x10] sm:$0xff]   ;;  %v127_v22 = vshrl.u32 %v126_v21, 7  ;;  %vm974_vm1 = vmmov 0   ;;  %vm620_vm2 = vcmask 31744  }
  0x81   :  { %v764_v6 = vld [vmem:[#allocation4] sm:$0xff]   ;;  %668 = vmatprep.subr.bf16.mxu1 %v763_v5  ;;  %v766_v8 = vld [vmem:[#allocation4 + $0x8] sm:$0xff]   ;;  %v770_v12 = vld [vmem:[#allocation4 + $0x18] sm:$0xff]   ;;  %708 = vmatprep.subr.bf16.mxu0 %v973_v55 }
  0x82   :  { %669 = vmatpush3.bf16.msra.mxu1 %v764_v6  ;;  %v771_v13 = vld [vmem:[#allocation4 + $0x60] sm:$0xff]   ;;  %v773_v15 = vld [vmem:[#allocation4 + $0x68] sm:$0xff]   ;;  %v775_v17 = vld [vmem:[#allocation4 + $0x70] sm:$0xff]   ;;  %v128_v23 = vsub.s32 0, %v127_v22  ;;  %v132_v25 = vsub.s32 1, %v127_v22 }
  0x83   :  { %632 = vmatmul.mubr.msk.bf16.vlgmr.msra.gmra.mrb[0].mxu0 %vm146_vm0, %v121_v4  ;;  %670 = vmatprep.subr.bf16.mxu1 %v765_v7  ;;  %v772_v14 = vld [vmem:[#allocation4 + $0x20] sm:$0xff]   ;;  %v774_v16 = vld [vmem:[#allocation4 + $0x28] sm:$0xff]   ;;  %v776_v18 = vld [vmem:[#allocation4 + $0x30] sm:$0xff]  }
  0x84   :  { %v777_v19 = vld [vmem:[#allocation4 + $0x78] sm:$0xff]   ;;  %v124_v24 = vld [vmem:[%s1150_s2] sm:$0x3]  ;;  %v779_v54 = vld [vmem:[#allocation7] sm:$0xff]   ;;  %724 = vmatprep.mubr.msk.bf16.mxu0 %vm974_vm1, %v973_v55 }
  0x85   :  { %v778_v20 = vld [vmem:[#allocation4 + $0x38] sm:$0xff]   ;;  %v129_v26 = vrot.slane %v124_v24, %v128_v23  ;;  %v133_v27 = vrot.slane %v124_v24, %v132_v25  ;;  %709 = vmatpush3.bf16.msra.mxu0 %v779_v54  ;;  %v780_v56 = vld [vmem:[#allocation7 + $0x8] sm:$0xff]   ;;  %v783_v59 = vld [vmem:[#allocation7 + $0x20] sm:$0xff]  }
  0x86   :  { %671 = vmatpush3.bf16.msra.mxu1 %v766_v8  ;;  %710 = vmatprep.subr.bf16.mxu0 %v973_v55  ;;  %v781_v57 = vld [vmem:[#allocation7 + $0x10] sm:$0xff]   ;;  %v782_v58 = vld [vmem:[#allocation7 + $0x18] sm:$0xff]   ;;  %v784_v60 = vld [vmem:[#allocation7 + $0x28] sm:$0xff]  }
  0x87   :  { %672 = vmatprep.subr.bf16.mxu1 %v767_v9  ;;  %v785_v61 = vld [vmem:[#allocation7 + $0x30] sm:$0xff]   ;;  %v786_v62 = vld [vmem:[#allocation7 + $0x38] sm:$0xff]   ;;  %v787_v63 = vld [vmem:[#allocation10] sm:$0xff]  }
  0x88   :  { %v788_v0 = vld [vmem:[#allocation10 + $0x8] sm:$0xff]   ;;  %v789_v1 = vld [vmem:[#allocation10 + $0x10] sm:$0xff]   ;;  %v790_v2 = vld [vmem:[#allocation10 + $0x18] sm:$0xff]  }
  0x89   :  { %711 = vmatpush3.bf16.msra.mxu0 %v780_v56  ;;  %v791_v3 = vld [vmem:[#allocation10 + $0x20] sm:$0xff]   ;;  %v792_v4 = vld [vmem:[#allocation10 + $0x28] sm:$0xff]   ;;  %v633_v6 = vld [vmem:[#allocation6] ss:$0 sm:$0xff] }
  0x8a   :  { %673 = vmatpush3.bf16.msra.mxu1 %v768_v10  ;;  %712 = vmatprep.subr.bf16.mxu0 %v973_v55  ;;  %v793_v22 = vld [vmem:[#allocation10 + $0x30] sm:$0xff]   ;;  %v794_v23 = vld [vmem:[#allocation10 + $0x38] sm:$0xff]  }
  0x8b   :  { %674 = vmatprep.subr.bf16.mxu1 %v769_v11  ;;  %v650_v24 = vld [vmem:[#allocation9] ss:$0 sm:$0xff] }
  0x8d   :  { %713 = vmatpush3.bf16.msra.mxu0 %v781_v57 }
  0x8e   :  { %675 = vmatpush3.bf16.msra.mxu1 %v770_v12  ;;  %714 = vmatprep.subr.bf16.mxu0 %v973_v55 }
  0x8f   :  { %676 = vmatprep.subr.bf16.mxu1 %v771_v13 }
  0x91   :  { %715 = vmatpush3.bf16.msra.mxu0 %v782_v58 }
  0x92   :  { %677 = vmatpush3.bf16.msra.mxu1 %v772_v14  ;;  %716 = vmatprep.subr.bf16.mxu0 %v973_v55 }
  0x93   :  { %678 = vmatprep.subr.bf16.mxu1 %v773_v15 }
  0x95   :  { %717 = vmatpush3.bf16.msra.mxu0 %v783_v59 }
  0x96   :  { %679 = vmatpush3.bf16.msra.mxu1 %v774_v16  ;;  %718 = vmatprep.subr.bf16.mxu0 %v973_v55 }
  0x97   :  { %680 = vmatprep.subr.bf16.mxu1 %v775_v17 }
  0x99   :  { %719 = vmatpush3.bf16.msra.mxu0 %v784_v60 }
  0x9a   :  { %681 = vmatpush3.bf16.msra.mxu1 %v776_v18  ;;  %720 = vmatprep.subr.bf16.mxu0 %v973_v55 }
  0x9b   :  { %682 = vmatprep.subr.bf16.mxu1 %v777_v19 }
  0x9d   :  { %721 = vmatpush3.bf16.msra.mxu0 %v785_v61 }
  0x9e   :  { %683 = vmatpush3.bf16.msra.mxu1 %v778_v20  ;;  %722 = vmatprep.subr.bf16.mxu0 %v973_v55 }
  0x9f   :  { %728 = vmatprep.subr.bf16.mxu1 %v973_v55 }
  0xa1   :  { %723 = vmatpush3.bf16.msra.mxu0 %v786_v62 }
 0x156   :  { %v184_v28 = vpop.f32.mrb[0].mxu0 }
 0x157   :  { %v185_v29 = vadd.f32 %v184_v28, %v129_v26  ;;  %v186_v30 = vpop.f32.mrb[1].mxu0 }
 0x158   :  { %v187_v31 = vadd.f32 %v186_v30, %v133_v27  ;;  %v188_v32 = vpop.f32.mrb[2].mxu0 }
 0x159   :  { %v191_v33 = vmul.f32 %v185_v29, %v185_v29  ;;  %v189_v34 = vpop.f32.mrb[3].mxu0  ;;  %v659_v32 = vld [vmem:[#allocation12] ss:$0 sm:$0xff] }
 0x15a   :  { %v192_v35 = vmul.f32 %v187_v31, %v187_v31 }
 0x15b   :  { %v193_v36 = vmul.f32 %v191_v33, %v185_v29 }
 0x15c   :  { %v194_v37 = vmul.f32 %v192_v35, %v187_v31 }
 0x15d   :  { %v195_v38 = vmul.f32 0.044715, %v193_v36 }
 0x15e   :  { %v196_v39 = vmul.f32 0.044715, %v194_v37 }
 0x15f   :  { %v197_v40 = vadd.f32 %v195_v38, %v185_v29 }
 0x160   :  { %v198_v41 = vadd.f32 %v196_v39, %v187_v31 }
 0x161   :  { %v199_v42 = vmul.f32 0.7978846, %v197_v40 }
 0x162   :  { %v200_v43 = vmul.f32 0.7978846, %v198_v41 }
 0x163   :  { %795 = vtanh.f32 %v199_v42 }
 0x164   :  { %797 = vtanh.f32 %v200_v43 }
 0x16d   :  { %v796_v44 = vpop.eup %795 }
 0x16e   :  { %v798_v45 = vpop.eup %797  ;;  %v203_v46 = vadd.f32 1.0, %v796_v44 }
 0x16f   :  { %v204_v47 = vadd.f32 1.0, %v798_v45 }
 0x170   :  { %v205_v48 = vmul.f32 0.5, %v203_v46 }
 0x171   :  { %v206_v49 = vmul.f32 0.5, %v204_v47 }
 0x172   :  { %v207_v50 = vmul.f32 %v205_v48, %v185_v29 }
 0x173   :  { %v208_v51 = vmul.f32 %v206_v49, %v187_v31 }
 0x174   :  { %v209_v53 = vpack.c.bf16 %v207_v50, %v207_v50 }
 0x175   :  { %v210_v52 = vpack.c.bf16 %v208_v51, %v208_v51 }
 0x177   :  { %378 = vmatprep.mubr.bf16.mxu1 %v210_v52 }
 0x178   :  { %379 = vmatmul.mubr.bf16.vlgmr.msra.gmra.mrb[0].mxu1 %v209_v53 }
 0x179   :  { %744 = vmatprep.mubr.msk.bf16.mxu1 %vm974_vm1, %v973_v55  ;;  %729 = vmatpush3.bf16.msra.mxu1 %v787_v63 }
 0x17a   :  { %730 = vmatprep.subr.bf16.mxu1 %v973_v55 }
 0x17d   :  { %731 = vmatpush3.bf16.msra.mxu1 %v788_v0 }
 0x17e   :  { %732 = vmatprep.subr.bf16.mxu1 %v973_v55 }
 0x181   :  { %733 = vmatpush3.bf16.msra.mxu1 %v789_v1 }
 0x182   :  { %734 = vmatprep.subr.bf16.mxu1 %v973_v55 }
 0x185   :  { %735 = vmatpush3.bf16.msra.mxu1 %v790_v2 }
 0x186   :  { %736 = vmatprep.subr.bf16.mxu1 %v973_v55 }
 0x189   :  { %737 = vmatpush3.bf16.msra.mxu1 %v791_v3 }
 0x18a   :  { %738 = vmatprep.subr.bf16.mxu1 %v973_v55 }
 0x18d   :  { %739 = vmatpush3.bf16.msra.mxu1 %v792_v4 }
 0x18e   :  { %740 = vmatprep.subr.bf16.mxu1 %v973_v55 }
 0x191   :  { %741 = vmatpush3.bf16.msra.mxu1 %v793_v22 }
 0x192   :  { %742 = vmatprep.subr.bf16.mxu1 %v973_v55 }
 0x195   :  { %743 = vmatpush3.bf16.msra.mxu1 %v794_v23 }
 0x24b   :  { %v684_v5 = vpop.f32.mrb[0].mxu1 }
 0x24c   :  { %v685_v7 = vpop.f32.mrb[1].mxu1 }
 0x24d   :  { %v686_v8 = vadd.f32 %v685_v7, %v684_v5  ;;  %v687_v9 = vpop.f32.mrb[2].mxu1 }
 0x24e   :  { %v688_v10 = vpop.f32.mrb[3].mxu1 }
 0x24f   :  { %v381_v11 = vadd.f32 %v686_v8, %v633_v6 }
 0x251   :  { %v386_v12 = vmul.f32 %v381_v11, %v381_v11 }
 0x253   :  { %v387_v13 = vmul.f32 %v386_v12, %v381_v11 }
 0x255   :  { %v388_v14 = vmul.f32 0.044715, %v387_v13 }
 0x257   :  { %v389_v15 = vadd.f32 %v388_v14, %v381_v11 }
 0x259   :  { %v390_v16 = vmul.f32 0.7978846, %v389_v15 }
 0x25b   :  { %799 = vtanh.f32 %v390_v16 }
 0x265   :  { %v800_v17 = vpop.eup %799 }
 0x266   :  { %v392_v18 = vadd.f32 1.0, %v800_v17 }
 0x268   :  { %v393_v19 = vmul.f32 0.5, %v392_v18 }
 0x26a   :  { %v394_v20 = vmul.f32 %v393_v19, %v381_v11 }
 0x26c   :  { %v395_v21 = vpack.c.bf16 %v394_v20, %v394_v20 }
 0x26e   :  { %725 = vmatmul.mubr.bf16.vlgmr.msra.gmra.mrb[4].mxu0 %v395_v21 }
 0x341   :  { %v501_v25 = vpop.f32.mrb[4].mxu0 }
 0x342   :  { %v502_v26 = vadd.f32 %v650_v24, %v501_v25  ;;  %v726_v27 = vpop.f32.mrb[5].mxu0 }
 0x343   :  { %v504_v28 = vpop.f32.mrb[6].mxu0 }
 0x344   :  { %v507_v29 = vmax.f32 %v502_v26, 0.0  ;;  %v727_v30 = vpop.f32.mrb[7].mxu0 }
 0x346   :  { %v508_v31 = vpack.c.bf16 %v507_v29, %v507_v29 }
 0x348   :  { %745 = vmatmul.mubr.bf16.vlgmr.msra.gmra.mrb[4].mxu1 %v508_v31 }
 0x41b   :  { %v614_v33 = vpop.f32.mrb[4].mxu1 }
 0x41c   :  { %v615_v34 = vadd.f32 %v659_v32, %v614_v33  ;;  %v746_v35 = vpop.f32.mrb[5].mxu1 }
 0x41d   :  { %v617_v36 = vpop.f32.mrb[6].mxu1 }
 0x41e   :  { %621 = vst.msk [vmem:[%s1157_s9] sm:$0xff] %vm620_vm2, %v615_v34  ;;  %v747_v37 = vpop.f32.mrb[7].mxu1 }
 0x41f   :  { %626 = vsyncpa [#allocation3], 1 }
 0x420   :  { %627 = vsyncpa [#allocation5], 1 }
 0x421   :  { %628 = vsyncpa [#allocation8], 1 }
 0x422   :  { %629 = vsyncpa [#allocation11], 1 }

</bundles_post_ra>
